<compile_context>
chip_gen: v5e
topology: v5e:2x2
jax: 0.10.0
libtpu: 0.0.40
codegen_flags: <defaults>
</compile_context>

<pallas_src>
from functools import partial

import jax
import jax.numpy as jnp
from jax.experimental import pallas as pl
from jax.experimental.pallas import tpu as pltpu


def _elem_err(g, p, recons_type: str):
    d = g - p
    if recons_type == 'l2':
        return d * d
    if recons_type == 'l1':
        return jnp.abs(d)
    if recons_type == 'l1_smooth':
        ad = jnp.abs(d)
        # torch smooth_l1_loss default beta=1.0
        return jnp.where(ad < 1.0, 0.5 * d * d, ad - 0.5)
    raise NotImplementedError(f'{recons_type} is not implemented')


def _colsum_kernel(gt_ref, pred_ref, out_ref, acc_ref, *,
                   recons_type: str, rows: int, tile_rows: int,
                   acc_rows: int, steps_inner: int, needs_mask: bool):
    """Accumulate per-feature column sums of the elementwise recon error."""
    c = pl.program_id(0)          # partial index ("parallel" -> dual-TC split)
    i = pl.program_id(1)          # reduction step ("arbitrary")
    n_chunks = tile_rows // acc_rows

    @pl.when(i == 0)
    def _():
        acc_ref[...] = jnp.zeros_like(acc_ref)

    row_start = (c * steps_inner + i) * tile_rows

    def accumulate(masked: bool):
        # Fixed-height accumulator: walk the tile in ACC_ROWS sublane chunks.
        # Static slices -> no dynamic-index overhead; total VPU work unchanged.
        for j in range(n_chunks):
            lo, hi = j * acc_rows, (j + 1) * acc_rows
            g = gt_ref[lo:hi, :].astype(jnp.float32)
            p = pred_ref[lo:hi, :].astype(jnp.float32)
            e = _elem_err(g, p, recons_type)
            if masked:
                # Zero contributions from rows past the end of the real array
                # (ragged tail of the last tile and fully-clamped duplicate
                # tiles of the second partial).
                row_ids = jax.lax.broadcasted_iota(jnp.int32, (acc_rows, 1), 0)
                valid = (row_ids + (row_start + lo)) < rows
                e = jnp.where(valid, e, 0.0)
            acc_ref[...] += e     # pure VPU, hidden under the input DMA

    if needs_mask:
        boundary = (row_start + tile_rows) > rows

        @pl.when(boundary)
        def _():
            accumulate(True)

        @pl.when(jnp.logical_not(boundary))
        def _():
            accumulate(False)
    else:
        accumulate(False)

    @pl.when(i == pl.num_programs(1) - 1)
    def _():
        # One short cross-sublane reduction per partial, only at the end.
        out_ref[...] = jnp.sum(acc_ref[...], axis=0, keepdims=True)[None]


def _chip_defaults():
    """(tile_rows, num_partials) per TPU generation.

    v7x: 2 TensorCores -> 2 partials; 3.2 TB/s per-TC HBM -> 2048-row tiles.
    v6e: 1 TC, 1024-row tiles (~86% of roofline). v5e/unknown: 1 TC, 512 rows.
    """
    kind = ''
    try:
        kind = jax.devices()[0].device_kind.lower()
    except Exception:
        pass
    if 'v7' in kind or 'tpu7' in kind:
        return 2048, 2
    if 'v6' in kind:
        return 1024, 1
    return 512, 1


def _recon_colsum_pallas(gt: jax.Array, pred: jax.Array, recons_type: str,
                         tile_rows: int | None = None,
                         num_partials: int | None = None,
                         acc_rows: int = 128):
    """Returns (colsum, rows): per-feature sum of elementwise error, row count."""
    assert gt.shape == pred.shape, 'gt / pred must match'
    feat = gt.shape[-1]
    gt2 = gt.reshape(-1, feat)          # no astype, no pad — stream native dtype
    pr2 = pred.reshape(-1, feat)
    rows = gt2.shape[0]

    if tile_rows is None or num_partials is None:
        dt, dp = _chip_defaults()
        tile_rows = dt if tile_rows is None else tile_rows
        num_partials = dp if num_partials is None else num_partials

    # Block sublane dim must be a multiple of 8 or the full extent; keep
    # tile_rows a multiple of the accumulator height so chunking is exact.
    if tile_rows >= rows:
        tile_rows = rows
        acc_rows = rows                 # single chunk, full-extent block
    else:
        acc_rows = max(8, (min(acc_rows, tile_rows) // 8) * 8)
        tile_rows = max(acc_rows, (tile_rows // acc_rows) * acc_rows)

    total_tiles = pl.cdiv(rows, tile_rows)
    num_partials = max(1, min(num_partials, total_tiles))   # never duplicate work
    steps_inner = pl.cdiv(total_tiles, num_partials)
    needs_mask = (num_partials * steps_inner * tile_rows) != rows

    def in_map(c, i):
        # Clamp so no block starts fully outside the array; the in-kernel mask
        # zeroes any duplicated / out-of-range rows.
        t = jnp.minimum(c * steps_inner + i, total_tiles - 1)
        return (t, 0)

    kernel = partial(_colsum_kernel,
                     recons_type=recons_type, rows=rows, tile_rows=tile_rows,
                     acc_rows=acc_rows, steps_inner=steps_inner,
                     needs_mask=needs_mask)

    # VMEM budget: 2 inputs x 2 pipeline buffers x tile + fixed acc + outputs.
    in_bytes = 2 * tile_rows * feat * (gt2.dtype.itemsize + pr2.dtype.itemsize)
    acc_bytes = acc_rows * feat * 4
    out_bytes = 2 * num_partials * feat * 4
    vmem_limit = int(min(max(in_bytes + acc_bytes + out_bytes + (8 << 20),
                             32 << 20), 60 << 20))

    # TODO(synk): on v7x, if xprof shows exposed DMA at step boundaries, add
    # pipeline_mode=pl.Buffered(3) to the two input BlockSpecs.
    out = pl.pallas_call(
        kernel,
        out_shape=jax.ShapeDtypeStruct((num_partials, 1, feat), jnp.float32),
        grid_spec=pltpu.PrefetchScalarGridSpec(
            num_scalar_prefetch=0,
            grid=(num_partials, steps_inner),
            in_specs=[
                pl.BlockSpec((tile_rows, feat), in_map),
                pl.BlockSpec((tile_rows, feat), in_map),
            ],
            out_specs=pl.BlockSpec((1, 1, feat), lambda c, i: (c, 0, 0)),
            scratch_shapes=[pltpu.VMEM((acc_rows, feat), jnp.float32)],
        ),
        compiler_params=pltpu.CompilerParams(
            dimension_semantics=("parallel", "arbitrary"),
            vmem_limit_bytes=vmem_limit),
    )(gt2, pr2)

    colsum = out.reshape(num_partials, feat).sum(axis=0)
    return colsum, rows


class Hm3dWholeBodyLoss:
    """JAX/Pallas port of mmotion Hm3dWholeBodyLoss forward."""

    def __init__(self, recons_type: str = 'l2', nb_joints: int = 52,
                 pos_body: float = 1.5, pos_hand: float = 1.5,
                 root: float = 1.0, feet: float = 1.0,
                 rot_body: float = 1.0, rot_hand: float = 1.0,
                 vel_body: float = 1.0, vel_hand: float = 1.0,
                 commit: float = 0.02):
        if recons_type not in ('l1', 'l2', 'l1_smooth'):
            raise NotImplementedError(f'{recons_type} is not implemented')
        self.recons_type = recons_type
        # NOTE: segment boundaries below are hardcoded exactly like the
        # reference forward (they do not depend on nb_joints there either).
        self.nb_joints = nb_joints
        self.pos_body = pos_body
        self.pos_hand = pos_hand
        self.rot_body = rot_body
        self.rot_hand = rot_hand
        self.root = root
        self.feet = feet
        self.vel_body = vel_body
        self.vel_hand = vel_hand
        self.commit = commit

    def __call__(self, inputs: dict, outputs: dict, data_samples=None):
        gt = inputs['motion']
        recons = outputs['pred_motion']
        D = gt.shape[-1]

        # One streaming pass over HBM produces per-feature error sums; the
        # per-segment means below are tiny JAX ops on a (D,)-vector.
        colsum, rows = _recon_colsum_pallas(gt, recons, self.recons_type)

        def seg_mean(a, b):
            return colsum[a:b].sum() / float(rows * (b - a))

        loss_dict = {
            'root_loss': self.root * seg_mean(0, 4),
            'pos_body_loss': self.pos_body * seg_mean(4, 67),
            'pos_hand_loss': self.pos_hand * seg_mean(67, 157),
            'vel_body_loss': self.vel_body * seg_mean(157, 157 + 22 * 3),
            'vel_hand_loss': self.vel_hand * seg_mean(157 + 22 * 3, 157 + 52 * 3),
            'rot_body_loss': self.rot_body * seg_mean(157 + 52 * 3,
                                                      157 + 52 * 3 + 21 * 6),
            'rot_hand_loss': self.rot_hand * seg_mean(157 + 52 * 3 + 21 * 6, D - 4),
            'feet_contact_loss': self.feet * seg_mean(D - 4, D),
            'commit_loss': self.commit * outputs['commit_loss'],
        }
        return loss_dict


if __name__ == "__main__":
    key = jax.random.PRNGKey(0)
    k1, k2, k3, k4, k5 = jax.random.split(key, 5)

    # HM3D whole-body feature dim: 4 root + 63 pos_body + 90 pos_hand
    # + 66 vel_body + 90 vel_hand + 126 rot_body + 180 rot_hand + 4 feet = 623
    D = 4 + 63 + 90 + 66 + 90 + 126 + 180 + 4
    assert D == 623
    B, T = 2, 8

    gt = jax.random.normal(k1, (B, T, D), dtype=jnp.float32)
    pred = gt + 0.1 * jax.random.normal(k2, (B, T, D), dtype=jnp.float32)
    commit = jnp.abs(jax.random.normal(k3, (), dtype=jnp.float32))

    loss_mod = Hm3dWholeBodyLoss(recons_type='l2')
    loss_dict = loss_mod({'motion': gt},
                         {'pred_motion': pred, 'commit_loss': commit})
    jax.block_until_ready(loss_dict)

    # correctness check against plain-JAX reference (mse, mean reduction)
    def ref_mean(a, b):
        d = gt[..., a:b] - pred[..., a:b]
        return jnp.mean(d * d)

    w = loss_mod
    refs = {
        'root_loss': w.root * ref_mean(0, 4),
        'pos_body_loss': w.pos_body * ref_mean(4, 67),
        'pos_hand_loss': w.pos_hand * ref_mean(67, 157),
        'vel_body_loss': w.vel_body * ref_mean(157, 223),
        'vel_hand_loss': w.vel_hand * ref_mean(223, 313),
        'rot_body_loss': w.rot_body * ref_mean(313, 439),
        'rot_hand_loss': w.rot_hand * ref_mean(439, D - 4),
        'feet_contact_loss': w.feet * ref_mean(D - 4, D),
        'commit_loss': 0.02 * commit,
    }
    for name, ref in refs.items():
        got = loss_dict[name]
        assert jnp.allclose(got, ref, rtol=1e-5, atol=1e-6), (name, float(got), float(ref))

    # Exercise the multi-tile / ragged-tail / clamped-duplicate-tile path with
    # forced small tiles and 2 partials (also covers the l1_smooth branch).
    rows2 = 600
    g2 = jax.random.normal(k4, (rows2, D), dtype=jnp.float32)
    p2 = g2 + 0.05 * jax.random.normal(k5, (rows2, D), dtype=jnp.float32)
    colsum, nrows = _recon_colsum_pallas(g2, p2, 'l1_smooth',
                                         tile_rows=128, num_partials=2)
    jax.block_until_ready(colsum)
    d2 = g2 - p2
    ad = jnp.abs(d2)
    ref_cs = jnp.sum(jnp.where(ad < 1.0, 0.5 * d2 * d2, ad - 0.5), axis=0)
    assert nrows == rows2
    assert jnp.allclose(colsum, ref_cs, rtol=1e-4, atol=1e-4), \
        float(jnp.max(jnp.abs(colsum - ref_cs)))

    print("KERNEL_OK")
</pallas_src>

<mosaic_0001>
module attributes {stable_mosaic.version = 11 : i64} {
  func.func @_colsum_kernel(%arg0: i32, %arg1: i32, %arg2: memref<16x623xf32, #tpu.memory_space<vmem>>, %arg3: memref<16x623xf32, #tpu.memory_space<vmem>>, %arg4: memref<1x1x623xf32, #tpu.memory_space<vmem>>, %arg5: memref<16x623xf32, #tpu.memory_space<vmem>>) attributes {dimension_semantics = [#tpu.dimension_semantics<parallel>, #tpu.dimension_semantics<arbitrary>], iteration_bounds = array<i64: 1, 1>, scalar_prefetch = 0 : i64, scratch_operands = 1 : i64, tpu.core_type = #tpu.core_type<tc>, window_params = [{transform_indices = @transform_0, window_bounds = array<i64: 16, 623>}, {transform_indices = @transform_1, window_bounds = array<i64: 16, 623>}, {transform_indices = @transform_2, window_bounds = array<i64: 1, 1, 623>}]} {
    %c0_i32 = arith.constant 0 : i32
    %0 = arith.cmpi eq, %arg1, %c0_i32 : i32
    %1 = arith.extui %0 : i1 to i32
    %c0_i32_0 = arith.constant 0 : i32
    %2 = arith.cmpi ne, %1, %c0_i32_0 : i32
    scf.if %2 {
      %cst = arith.constant 0.000000e+00 : f32
      %13 = vector.broadcast %cst : f32 to vector<16x623xf32>
      %c0_10 = arith.constant 0 : index
      %c0_11 = arith.constant 0 : index
      %14 = vector.load %arg5[%c0_10, %c0_11] : memref<16x623xf32, #tpu.memory_space<vmem>>, vector<16x623xf32>
      tpu.vector_store %arg5[%c0_10, %c0_11], %13 {strides = array<i32>} : memref<16x623xf32, #tpu.memory_space<vmem>>, vector<16x623xf32>,
    } else {
    }
    %c0 = arith.constant 0 : index
    %c0_1 = arith.constant 0 : index
    %3 = vector.load %arg2[%c0, %c0_1] : memref<16x623xf32, #tpu.memory_space<vmem>>, vector<16x623xf32>
    %c0_2 = arith.constant 0 : index
    %c0_3 = arith.constant 0 : index
    %4 = vector.load %arg3[%c0_2, %c0_3] : memref<16x623xf32, #tpu.memory_space<vmem>>, vector<16x623xf32>
    %5 = arith.subf %3, %4 : vector<16x623xf32>
    %6 = arith.mulf %5, %5 : vector<16x623xf32>
    %c0_4 = arith.constant 0 : index
    %c0_5 = arith.constant 0 : index
    %7 = vector.load %arg5[%c0_4, %c0_5] : memref<16x623xf32, #tpu.memory_space<vmem>>, vector<16x623xf32>
    %8 = arith.addf %7, %6 : vector<16x623xf32>
    %c0_6 = arith.constant 0 : index
    %c0_7 = arith.constant 0 : index
    %9 = vector.load %arg5[%c0_6, %c0_7] : memref<16x623xf32, #tpu.memory_space<vmem>>, vector<16x623xf32>
    tpu.vector_store %arg5[%c0_6, %c0_7], %8 {strides = array<i32>} : memref<16x623xf32, #tpu.memory_space<vmem>>, vector<16x623xf32>,
    %c0_i32_8 = arith.constant 0 : i32
    %10 = arith.cmpi eq, %arg1, %c0_i32_8 : i32
    %11 = arith.extui %10 : i1 to i32
    %c0_i32_9 = arith.constant 0 : i32
    %12 = arith.cmpi ne, %11, %c0_i32_9 : i32
    scf.if %12 {
      %c0_10 = arith.constant 0 : index
      %c0_11 = arith.constant 0 : index
      %13 = vector.load %arg5[%c0_10, %c0_11] : memref<16x623xf32, #tpu.memory_space<vmem>>, vector<16x623xf32>
      %cst = arith.constant dense<0.000000e+00> : vector<623xf32>
      %14 = vector.multi_reduction <add>, %13, %cst [0] : vector<16x623xf32> to vector<623xf32>
      %15 = vector.shape_cast %14 : vector<623xf32> to vector<1x623xf32>
      %16 = vector.shape_cast %15 : vector<1x623xf32> to vector<1x1x623xf32>
      %c0_12 = arith.constant 0 : index
      %c0_13 = arith.constant 0 : index
      %c0_14 = arith.constant 0 : index
      %17 = vector.load %arg4[%c0_12, %c0_13, %c0_14] : memref<1x1x623xf32, #tpu.memory_space<vmem>>, vector<1x1x623xf32>
      tpu.vector_store %arg4[%c0_12, %c0_13, %c0_14], %16 {strides = array<i32>} : memref<1x1x623xf32, #tpu.memory_space<vmem>>, vector<1x1x623xf32>,
    } else {
    }
    return
  }
  func.func @transform_0(%arg0: i32, %arg1: i32) -> (i32, i32) {
    %c1_i32 = arith.constant 1 : i32
    %0 = arith.muli %arg0, %c1_i32 : i32
    %1 = arith.addi %0, %arg1 : i32
    %c0_i32 = arith.constant 0 : i32
    %2 = arith.minsi %1, %c0_i32 : i32
    %c0_i32_0 = arith.constant 0 : i32
    %c0_i32_1 = arith.constant 0 : i32
    return %2, %c0_i32_0 : i32, i32
  }
  func.func @transform_1(%arg0: i32, %arg1: i32) -> (i32, i32) {
    %c1_i32 = arith.constant 1 : i32
    %0 = arith.muli %arg0, %c1_i32 : i32
    %1 = arith.addi %0, %arg1 : i32
    %c0_i32 = arith.constant 0 : i32
    %2 = arith.minsi %1, %c0_i32 : i32
    %c0_i32_0 = arith.constant 0 : i32
    %c0_i32_1 = arith.constant 0 : i32
    return %2, %c0_i32_0 : i32, i32
  }
  func.func @transform_2(%arg0: i32, %arg1: i32) -> (i32, i32, i32) {
    %c0_i32 = arith.constant 0 : i32
    %c0_i32_0 = arith.constant 0 : i32
    %c0_i32_1 = arith.constant 0 : i32
    return %arg0, %c0_i32, %c0_i32_0 : i32, i32, i32
  }
}

</mosaic_0001>

<bundles_post_ra>
// kernel: tpu_custom_call.1
= control target key start
LH: loop header
LB: loop body
LE: loop exit
PB: predicated region body
PF: predicated region fallthrough
CT: control target
= control target key end

     0   :  { %7 = vsyncpa [#allocation4], 0  ;;  %s367_s0 = inlined_call_operand.hbm [shape: f32[16,623], index: 0, kind: input, shape index: {}]   ;;  %s368_s1 = inlined_call_operand.hbm [shape: f32[16,623], index: 1, kind: input, shape index: {}]   ;;  %s369_s2 = inlined_call_operand.hbm [shape: f32[1,1,623], index: 2, kind: output, shape index: {}]  }
   0x1   :  { %8 = vsyncpa [#allocation7], 0 }
   0x2   :  { %9 = vsyncpa [#allocation5], 0  ;;  %s21_s11 = sshll.u32 %s367_s0, 4  ;;  %s331_s12 = smov [#allocation3]   ;;  %s22_s11 = int_to_ptr.hbm [resolvable:$true] %s21_s11 }
   0x3   :  { %s23_s13 = sshll.u32 %s331_s12, 4  ;;  %s41_s16 = sshll.u32 %s368_s1, 4  ;;  %s24_s13 = int_to_ptr.vmem [resolvable:$true] %s23_s13  ;;  %s42_s16 = int_to_ptr.hbm [resolvable:$true] %s41_s16 }
   0x4   :  { %s332_s17 = smov 640   ;;  %s333_s18 = smov 40  }
   0x5   :  { %29 = dma.hbm_to_vmem [thread:$0]  %s22_s11, 1280, %s24_s13, [#allocation4], %s332_s17, %s332_s17, %s333_s18  }
   0x6   :  { %s334_s19 = smov [#allocation6]  }
   0x7   :  { %s43_s20 = sshll.u32 %s334_s19, 4  ;;  %s44_s20 = int_to_ptr.vmem [resolvable:$true] %s43_s20 }
   0x8   :  { %49 = dma.hbm_to_vmem [thread:$0]  %s42_s16, 1280, %s44_s20, [#allocation7], %s332_s17, %s332_s17, %s333_s18  }
   0x9   :  { %325 = dma.done.wait [#allocation4], 1280  }
   0xa   :  { %326 = vsyncadd [#allocation4], 4294966016 }
   0xb   :  { %327 = dma.done.wait [#allocation7], 1280  }
   0xc   :  { %328 = vsyncadd [#allocation7], 4294966016  ;;  %vm74_vm0 = vcmask 908288   ;;  %v335_v0 = vmov 0.0   ;;  %v81_v1 = vld [vmem:[#allocation3] sm:$0xff]  ;;  %v91_v2 = vld [vmem:[#allocation6] sm:$0xff] }
   0xd   :  { %75 = vst.msk [vmem:[#allocation2 + $0x20] sm:$0xff] %vm74_vm0, %v335_v0  ;;  %v82_v3 = vld [vmem:[#allocation3 + $0x8] sm:$0xff]  ;;  %v101_v4 = vsub.f32 %v81_v1, %v91_v2  ;;  %v92_v5 = vld [vmem:[#allocation6 + $0x8] sm:$0xff]  ;;  %v83_v6 = vld [vmem:[#allocation3 + $0x10] sm:$0xff]  ;;  %vm211_vm1 = vcmask 1040384   ;;  %vm213_vm2 = vcmask 1041408  }
   0xe   :  { %80 = vst.msk [vmem:[#allocation2 + $0x48] sm:$0xff] %vm74_vm0, %v335_v0  ;;  %v93_v7 = vld [vmem:[#allocation6 + $0x10] sm:$0xff]  ;;  %v102_v8 = vsub.f32 %v82_v3, %v92_v5  ;;  %v84_v10 = vld [vmem:[#allocation3 + $0x18] sm:$0xff]  ;;  %v94_v11 = vld [vmem:[#allocation6 + $0x18] sm:$0xff]  ;;  %vm215_vm3 = vcmask 1043459   ;;  %s336_s0 = smov [#allocation8]  }
   0xf   :  { %v103_v9 = vsub.f32 %v83_v6, %v93_v7  ;;  %v85_v12 = vld [vmem:[#allocation3 + $0x20] sm:$0xff]  ;;  %v111_v13 = vmul.f32 %v101_v4, %v101_v4  ;;  %v104_v14 = vsub.f32 %v84_v10, %v94_v11  ;;  %v95_v15 = vld [vmem:[#allocation6 + $0x20] sm:$0xff]  ;;  %v86_v17 = vld [vmem:[#allocation3 + $0x28] sm:$0xff]  ;;  %s230_s1 = sshll.u32 %s336_s0, 4  ;;  %s232_s23 = sshll.u32 %s369_s2, 4  ;;  %vm217_vm4 = vcmask 1042432   ;;  %s231_s1 = int_to_ptr.vmem [resolvable:$true] %s230_s1  ;;  %s233_s23 = int_to_ptr.hbm [resolvable:$true] %s232_s23 }
  0x10   :  { %v112_v18 = vmul.f32 %v102_v8, %v102_v8  ;;  %v105_v20 = vsub.f32 %v85_v12, %v95_v15  ;;  %v96_v21 = vld [vmem:[#allocation6 + $0x28] sm:$0xff]  ;;  %v87_v22 = vld [vmem:[#allocation3 + $0x30] sm:$0xff]  ;;  %v97_v23 = vld [vmem:[#allocation6 + $0x30] sm:$0xff] }
  0x11   :  { %v113_v19 = vmul.f32 %v103_v9, %v103_v9  ;;  %v114_v24 = vmul.f32 %v104_v14, %v104_v14  ;;  %v106_v25 = vsub.f32 %v86_v17, %v96_v21  ;;  %v107_v26 = vsub.f32 %v87_v22, %v97_v23  ;;  %v88_v27 = vld [vmem:[#allocation3 + $0x38] sm:$0xff]  ;;  %v98_v28 = vld [vmem:[#allocation6 + $0x38] sm:$0xff]  ;;  %v89_v29 = vld [vmem:[#allocation3 + $0x40] sm:$0xff] }
  0x12   :  { %v115_v30 = vmul.f32 %v105_v20, %v105_v20  ;;  %v108_v31 = vsub.f32 %v88_v27, %v98_v28  ;;  %v99_v32 = vld [vmem:[#allocation6 + $0x40] sm:$0xff]  ;;  %v90_v33 = vld [vmem:[#allocation3 + $0x48] sm:$0xff]  ;;  %v100_v34 = vld [vmem:[#allocation6 + $0x48] sm:$0xff]  ;;  %v220_v22 = vlaneseq }
  0x13   :  { %v116_v35 = vmul.f32 %v106_v25, %v106_v25  ;;  %v117_v36 = vmul.f32 %v107_v26, %v107_v26  ;;  %v109_v37 = vsub.f32 %v89_v29, %v99_v32  ;;  %v110_v40 = vsub.f32 %v90_v33, %v100_v34 }
  0x14   :  { %v125_v16 = vld [vmem:[#allocation2 + $0x20] sm:$0xff]  ;;  %v118_v39 = vmul.f32 %v108_v31, %v108_v31  ;;  %vm222_vm5 = vcmp.lt.s32.totalorder %v220_v22, 623 }
  0x15   :  { %v135_v38 = vadd.f32 %v125_v16, %v115_v30  ;;  %v119_v41 = vmul.f32 %v109_v37, %v109_v37  ;;  %v130_v42 = vld [vmem:[#allocation2 + $0x48] sm:$0xff]  ;;  %v120_v43 = vmul.f32 %v110_v40, %v110_v40  ;;  %v165_v44 = vadd.f32 %v116_v35, %v111_v13 }
  0x16   :  { %v172_v45 = vadd.f32 %v117_v36, %v112_v18  ;;  %v179_v47 = vadd.f32 %v118_v39, %v113_v19 }
  0x17   :  { %146 = vst.msk [vmem:[#allocation2 + $0x20] sm:$0xff] %vm74_vm0, %v135_v38  ;;  %v140_v46 = vadd.f32 %v130_v42, %v120_v43  ;;  %v166_v48 = vrot.slane %v165_v44, 4  ;;  %v186_v50 = vadd.f32 %v119_v41, %v114_v24 }
  0x18   :  { %v173_v49 = vrot.slane %v172_v45, 4  ;;  %v180_v51 = vrot.slane %v179_v47, 4 }
  0x19   :  { %v187_v53 = vrot.slane %v186_v50, 4  ;;  %151 = vst.msk [vmem:[#allocation2 + $0x48] sm:$0xff] %vm74_vm0, %v140_v46  ;;  %v167_v54 = vadd.f32 %v166_v48, %v165_v44 }
  0x1a   :  { %v174_v52 = vadd.f32 %v173_v49, %v172_v45  ;;  %v181_v55 = vadd.f32 %v180_v51, %v179_v47 }
  0x1b   :  { %v188_v57 = vadd.f32 %v187_v53, %v186_v50  ;;  %v168_v60 = vrot.slane %v167_v54, 2 }
  0x1c   :  { %v175_v56 = vrot.slane %v174_v52, 2  ;;  %v182_v59 = vrot.slane %v181_v55, 2 }
  0x1d   :  { %v189_v62 = vrot.slane %v188_v57, 2  ;;  %v169_v2 = vadd.f32 %v168_v60, %v167_v54 }
  0x1e   :  { %v159_v58 = vld [vmem:[#allocation2 + $0x20] sm:$0xff]  ;;  %v176_v61 = vadd.f32 %v175_v56, %v174_v52  ;;  %v183_v1 = vadd.f32 %v182_v59, %v181_v55 }
  0x1f   :  { %v193_v63 = vsel %vm74_vm0, %v159_v58, 0.0  ;;  %v190_v5 = vadd.f32 %v189_v62, %v188_v57  ;;  %v170_v9 = vrot.slane %v169_v2, 1 }
  0x20   :  { %v164_v0 = vld [vmem:[#allocation2 + $0x48] sm:$0xff]  ;;  %v177_v3 = vrot.slane %v176_v61, 1  ;;  %v184_v7 = vrot.slane %v183_v1, 1 }
  0x21   :  { %v194_v4 = vsel %vm74_vm0, %v164_v0, 0.0  ;;  %v191_v11 = vrot.slane %v190_v5, 1  ;;  %v171_v15 = vadd.f32 %v170_v9, %v169_v2 }
  0x22   :  { %v195_v6 = vadd.f32 %v194_v4, %v193_v63  ;;  %v178_v10 = vadd.f32 %v177_v3, %v176_v61  ;;  %v185_v13 = vadd.f32 %v184_v7, %v183_v1 }
  0x23   :  { %v192_v17 = vadd.f32 %v191_v11, %v190_v5 }
  0x24   :  { %v196_v8 = vrot.slane %v195_v6, 4  ;;  %v207_v16 = vrot.slane %v178_v10, 7  ;;  %v208_v20 = vrot.slane %v185_v13, 6 }
  0x25   :  { %v209_v24 = vrot.slane %v192_v17, 5 }
  0x26   :  { %v197_v12 = vadd.f32 %v196_v8, %v195_v6  ;;  %v212_v21 = vsel %vm211_vm1, %v171_v15, %v207_v16 }
  0x27   :  { %v214_v26 = vsel %vm213_vm2, %v212_v21, %v208_v20 }
  0x28   :  { %v198_v14 = vrot.slane %v197_v12, 2 }
  0x2a   :  { %v199_v18 = vadd.f32 %v198_v14, %v197_v12 }
  0x2c   :  { %v200_v19 = vrot.slane %v199_v18, 1 }
  0x2e   :  { %v201_v23 = vadd.f32 %v200_v19, %v199_v18 }
  0x30   :  { %v210_v25 = vrot.slane %v201_v23, 4 }
  0x32   :  { %v216_v27 = vsel %vm215_vm3, %v209_v24, %v210_v25 }
  0x33   :  { %v218_v28 = vsel %vm217_vm4, %v214_v26, %v216_v27 }
  0x34   :  { %224 = vst.msk [vmem:[#allocation8] sm:$0x1f] %vm222_vm5, %v218_v28 }
  0x35   :  { %235 = dma.vmem_to_hbm [thread:$0]  %s231_s1, 80, %s233_s23, [#allocation5]  }
  0x36   :  { %329 = dma.done.wait [#allocation5], 80  }
  0x37   :  { %330 = vsyncadd [#allocation5], 4294967216 }
  0x38   :  { %240 = vsyncpa [#allocation4], 1 }
  0x39   :  { %241 = vsyncpa [#allocation7], 1 }
  0x3a   :  { %242 = vsyncpa [#allocation5], 1 }

</bundles_post_ra>
